<compile_context>
chip_gen: v7x
topology: tpu7x:2x2x1
jax: 0.10.0
libtpu: 0.0.40
codegen_flags: <defaults>
</compile_context>

<pallas_src>
import math

import jax
import jax.numpy as jnp
from jax import lax
from jax.experimental import pallas as pl
from jax.experimental.pallas import tpu as pltpu

B, T = 2, 16
WIDTH = 128        # block width
LRU_WIDTH = 128    # lru width (lru_width=None -> width)
NUM_HEADS = 4
CONV_K = 4         # conv1d_temporal_width

SQRT_2_OVER_PI = 0.7978845608028654


def _gelu_tanh(x):
    # Matches torch nn.functional.gelu(x, approximate='tanh')
    return 0.5 * x * (1.0 + jnp.tanh(SQRT_2_OVER_PI * (x + 0.044715 * x * x * x)))


def _make_recurrent_kernel(b, t, l, conv_k, scan_shifts):
    """Builds the kernel body with shapes baked in as Python constants."""
    bt = b * t
    t_is_pow2 = (t & (t - 1)) == 0

    def kernel(x_ref, seg_ref, wyx_ref, wg_ref, misc_ref,
               out_ref, traj_ref, cstate_ref):
        f32 = jnp.float32
        xb = x_ref[...].astype(f32)           # (bt, W)

        misc = misc_ref[...]                  # (8, 2L) packed small params
        b_yx = misc[0:1, :]                   # [by | bx]
        b_g = misc[1:2, :]                    # [bi | ba]
        conv_b = misc[2:3, :l]                # conv bias
        sp_a = misc[2:3, l:]                  # softplus(a_param), precomputed on host

        # Local time index within each length-t batch block, generated in-kernel
        # (no (bt, L) index DMA).  t is a Python constant.
        loc = lax.broadcasted_iota(jnp.int32, (bt, l), 0)
        loc = (loc & (t - 1)) if t_is_pow2 else (loc % t)

        # Segment-reset mask, broadcast once from the (bt, 1) int32 column.
        seg = jnp.broadcast_to(seg_ref[...], (bt, l))
        reset = seg == 0                       # bool (bt, l)

        # ---- fused linear_y | linear_x : one 256-wide MXU pass ----
        proj = jnp.dot(xb, wyx_ref[...], preferred_element_type=f32) + b_yx
        y_lin = proj[:, :l]
        xl = proj[:, l:]
        g = _gelu_tanh(y_lin)

        # Conv1D cache = last (K-1) tokens of the conv input, per batch.
        for bb in range(b):
            cstate_ref[bb] = xl[bb * t + t - (conv_k - 1): bb * t + t, :].astype(
                cstate_ref.dtype)

        # ---- causal depthwise temporal conv: XLU sublane rolls + VPU FMAs ----
        # shifted[r] = xl[r - j]; rows with loc < j (segment start / previous
        # batch block) are zeroed, which is the causal zero left padding.
        conv = xl * misc[3:4, :l] + conv_b
        for j in range(1, conv_k):
            shifted = pltpu.roll(xl, shift=j, axis=0)
            shifted = jnp.where(loc >= j, shifted, 0.0)
            conv = conv + shifted * misc[3 + j:4 + j, :l]

        # ---- RG-LRU gates: fused input-gate | a-gate matmul ----
        gates = jax.nn.sigmoid(
            jnp.dot(conv, wg_ref[...], preferred_element_type=f32) + b_g)
        gate_x = gates[:, :l]
        gate_a = gates[:, l:]

        log_a = -8.0 * gate_a * sp_a
        a = jnp.exp(log_a)
        mult = jnp.where(reset, 1.0, jnp.sqrt(1.0 - a * a))   # a^2 as a*a
        nx = conv * gate_x * mult

        # Carry coefficient: zeroed at segment resets and batch-block starts
        # (exact for cache=None, h_{-1} = 0).
        # TODO(synk): when a decode/cache path or chunked T-grid is added, seed
        # the first row with the carried h instead of hard-zeroing.
        acc_a = jnp.where(jnp.logical_or(reset, loc == 0), 0.0, a)
        acc_b = nx

        # ---- log-step associative (Hillis-Steele) scan of h_t = a_t*h_{t-1}+nx_t
        # Each row holds an affine map (A, B); combine with the row d places
        # earlier via pltpu.roll on the otherwise-idle XLU, identity (A=1, B=0)
        # where fewer than d predecessors exist in the batch block.  Exact
        # (no MXU), log2(t) fully-vectorized steps, no serial loop.
        for d in scan_shifts:
            valid = loc >= d
            a_sh = jnp.where(valid, pltpu.roll(acc_a, shift=d, axis=0), 1.0)
            b_sh = jnp.where(valid, pltpu.roll(acc_b, shift=d, axis=0), 0.0)
            acc_b = acc_a * b_sh + acc_b
            acc_a = acc_a * a_sh

        h = acc_b                               # (bt, L) f32 trajectory of h_t

        traj_ref[...] = h.astype(traj_ref.dtype)
        out_ref[...] = (h * g).astype(out_ref.dtype)

    return kernel


def recurrent_block_forward(x, segment_pos, params):
    b, t, w = x.shape
    l = params["wy"].shape[1]
    bt = b * t
    conv_k = params["conv_w"].shape[0]
    f32 = jnp.float32

    # Hillis-Steele strides (1, 2, 4, ... < t).
    scan_shifts = []
    d = 1
    while d < t:
        scan_shifts.append(d)
        d *= 2

    # ---- host-side layout plumbing (tiny) ----
    x2d = x.reshape(bt, w)
    seg_col = segment_pos.reshape(bt, 1).astype(jnp.int32)

    # Fused projection / gate weights.
    w_yx = jnp.concatenate([params["wy"], params["wx"]], axis=1)     # (W, 2L)
    w_g = jnp.concatenate([params["wi"], params["wa"]], axis=1)      # (L, 2L)
    sp_a = jax.nn.softplus(params["a_param"])                        # stable softplus

    # Pack all tiny (1, L) params + conv taps into one aligned (8, 2L) tile.
    misc = jnp.zeros((8, 2 * l), f32)
    misc = misc.at[0, :l].set(params["by"][0]).at[0, l:].set(params["bx"][0])
    misc = misc.at[1, :l].set(params["bi"][0]).at[1, l:].set(params["ba"][0])
    misc = misc.at[2, :l].set(params["conv_b"][0]).at[2, l:].set(sp_a[0])
    misc = misc.at[3:3 + conv_k, :l].set(params["conv_w"])

    kernel = _make_recurrent_kernel(b, t, l, conv_k, tuple(scan_shifts))

    out_shapes = (
        jax.ShapeDtypeStruct((bt, l), x.dtype),             # out = lru * gelu(y)
        jax.ShapeDtypeStruct((bt, l), x.dtype),             # rg_lru trajectory
        jax.ShapeDtypeStruct((b, conv_k - 1, l), x.dtype),  # conv1d state
    )

    vmem = lambda: pl.BlockSpec(memory_space=pltpu.MemorySpace.VMEM)

    # Gridless call: ~300 KiB of operands, everything fits comfortably in VMEM.
    out2d, traj2d, cstate = pl.pallas_call(
        kernel,
        out_shape=out_shapes,
        in_specs=[vmem() for _ in range(5)],
        out_specs=(vmem(), vmem(), vmem()),
    )(x2d, seg_col, w_yx, w_g, misc)

    out = out2d.reshape(b, t, l)
    traj = traj2d.reshape(b, t, l)
    # rg_lru last state is just the last trajectory row per batch -> slice on
    # the host instead of emitting a separate kernel output.
    rg_lru_state = traj[:, -1, :][None, ...].astype(f32)    # (1, B, L) float32
    return out, traj, (rg_lru_state, cstate)


def init_params(key):
    keys = jax.random.split(key, 6)
    f32 = jnp.float32

    # linear_y / linear_x: normal(0, sqrt(1/width)), zero bias.
    std_lin = math.sqrt(1.0 / WIDTH)
    wy = std_lin * jax.random.normal(keys[0], (WIDTH, LRU_WIDTH), f32)
    wx = std_lin * jax.random.normal(keys[1], (WIDTH, LRU_WIDTH), f32)
    by = jnp.zeros((1, LRU_WIDTH), f32)
    bx = jnp.zeros((1, LRU_WIDTH), f32)

    # Conv1D: w_init_variance_scale = 0.01 -> std = sqrt(0.01 / temporal_width).
    std_conv = math.sqrt(0.01 / CONV_K)
    conv_w = std_conv * jax.random.normal(keys[2], (CONV_K, LRU_WIDTH), f32)
    conv_b = jnp.zeros((1, LRU_WIDTH), f32)

    # RG-LRU block-diagonal gates: std = sqrt(1 / block_width), zero bias.
    bw = LRU_WIDTH // NUM_HEADS
    std_gate = math.sqrt(1.0 / bw)
    wi_blocks = std_gate * jax.random.normal(keys[3], (NUM_HEADS, bw, bw), f32)
    wa_blocks = std_gate * jax.random.normal(keys[4], (NUM_HEADS, bw, bw), f32)
    wi = jax.scipy.linalg.block_diag(*[wi_blocks[h] for h in range(NUM_HEADS)])
    wa = jax.scipy.linalg.block_diag(*[wa_blocks[h] for h in range(NUM_HEADS)])
    bi = jnp.zeros((1, LRU_WIDTH), f32)
    ba = jnp.zeros((1, LRU_WIDTH), f32)

    # a_param: rnn_param_init with radius uniform in [0.9, 0.999], softplus transform.
    min_rad, max_rad, eps = 0.9, 0.999, 1e-8
    u = jax.random.uniform(keys[5], (1, LRU_WIDTH), f32,
                           minval=min_rad ** 2 + eps, maxval=max_rad ** 2 + eps)
    t0 = 0.5 * jnp.log(u)
    a_param = jnp.log(jnp.exp(-t0) - 1.0)   # inverse softplus

    return dict(wy=wy, by=by, wx=wx, bx=bx, conv_w=conv_w, conv_b=conv_b,
                wi=wi, bi=bi, wa=wa, ba=ba, a_param=a_param)


def reference(x, segment_pos, p):
    """Pure-JAX reference with identical math (for correctness checking)."""
    y = x @ p["wy"] + p["by"]
    g = _gelu_tanh(y)
    xl = x @ p["wx"] + p["bx"]
    conv_state = xl[:, T - (CONV_K - 1):, :]

    acc = jnp.zeros_like(xl) + p["conv_b"]
    for j in range(CONV_K):
        if j == 0:
            shifted = xl
        else:
            shifted = jnp.pad(xl[:, :T - j, :], ((0, 0), (j, 0), (0, 0)))
        acc = acc + shifted * p["conv_w"][j][None, None, :]
    conv_out = acc

    gate_x = jax.nn.sigmoid(conv_out @ p["wi"] + p["bi"])
    gate_a = jax.nn.sigmoid(conv_out @ p["wa"] + p["ba"])
    log_a = -8.0 * gate_a * jnp.log1p(jnp.exp(p["a_param"]))
    a = jnp.exp(log_a)
    a_sq = jnp.exp(2.0 * log_a)
    reset = (segment_pos == 0)[..., None]
    mult = jnp.where(reset, 1.0, jnp.sqrt(1.0 - a_sq))
    nx = conv_out * gate_x * mult
    a = jnp.where(reset, 0.0, a)

    def step(h, inp):
        a_t, x_t = inp
        h = a_t * h + x_t
        return h, h

    h0 = jnp.zeros((x.shape[0], LRU_WIDTH), jnp.float32)
    h_last, ys = lax.scan(step, h0, (jnp.swapaxes(a, 0, 1), jnp.swapaxes(nx, 0, 1)))
    lru = jnp.swapaxes(ys, 0, 1)
    out = lru * g
    return out, lru, (h_last[None], conv_state)


if __name__ == "__main__":
    key = jax.random.PRNGKey(0)
    pkey, xkey = jax.random.split(key)
    params = init_params(pkey)

    x = jax.random.normal(xkey, (B, T, WIDTH), jnp.float32)
    segment_pos = jnp.tile(jnp.arange(T, dtype=jnp.int32)[None, :], (B, 1))

    out, traj, (rg_state, conv_state) = recurrent_block_forward(x, segment_pos, params)
    jax.block_until_ready((out, traj, rg_state, conv_state))

    r_out, r_traj, (r_state, r_cstate) = reference(x, segment_pos, params)
    assert out.shape == (B, T, LRU_WIDTH)
    assert traj.shape == (B, T, LRU_WIDTH)
    assert conv_state.shape == (B, CONV_K - 1, LRU_WIDTH)
    assert rg_state.shape == (1, B, LRU_WIDTH)
    assert jnp.allclose(out, r_out, atol=5e-4, rtol=5e-4), "output mismatch"
    assert jnp.allclose(traj, r_traj, atol=5e-4, rtol=5e-4), "lru trajectory mismatch"
    assert jnp.allclose(conv_state, r_cstate, atol=5e-4, rtol=5e-4), "conv state mismatch"
    assert jnp.allclose(rg_state, r_state, atol=5e-4, rtol=5e-4), "lru state mismatch"

    print("KERNEL_OK")
</pallas_src>

<mosaic_0001>
module attributes {stable_mosaic.version = 11 : i64} {
  func.func @kernel(%arg0: memref<32x128xf32, #tpu.memory_space<vmem>>, %arg1: memref<32x1xi32, #tpu.memory_space<vmem>>, %arg2: memref<128x256xf32, #tpu.memory_space<vmem>>, %arg3: memref<128x256xf32, #tpu.memory_space<vmem>>, %arg4: memref<8x256xf32, #tpu.memory_space<vmem>>, %arg5: memref<32x128xf32, #tpu.memory_space<vmem>>, %arg6: memref<32x128xf32, #tpu.memory_space<vmem>>, %arg7: memref<2x3x128xf32, #tpu.memory_space<vmem>>) attributes {dimension_semantics = [], scalar_prefetch = 0 : i64, scratch_operands = 0 : i64, tpu.core_type = #tpu.core_type<tc>} {
    %c0 = arith.constant 0 : index
    %c0_0 = arith.constant 0 : index
    %0 = vector.load %arg0[%c0, %c0_0] : memref<32x128xf32, #tpu.memory_space<vmem>>, vector<32x128xf32>
    %c0_1 = arith.constant 0 : index
    %c0_2 = arith.constant 0 : index
    %1 = vector.load %arg4[%c0_1, %c0_2] : memref<8x256xf32, #tpu.memory_space<vmem>>, vector<8x256xf32>
    %2 = vector.extract_strided_slice %1 {offsets = [0, 0], sizes = [1, 256], strides = [1, 1]} : vector<8x256xf32> to vector<1x256xf32>
    %3 = vector.extract_strided_slice %1 {offsets = [1, 0], sizes = [1, 256], strides = [1, 1]} : vector<8x256xf32> to vector<1x256xf32>
    %4 = vector.extract_strided_slice %1 {offsets = [2, 0], sizes = [1, 128], strides = [1, 1]} : vector<8x256xf32> to vector<1x128xf32>
    %5 = vector.extract_strided_slice %1 {offsets = [2, 128], sizes = [1, 128], strides = [1, 1]} : vector<8x256xf32> to vector<1x128xf32>
    %6 = tpu.iota {dimensions = array<i32: 0>} : vector<32x128xi32>
    %c15_i32 = arith.constant 15 : i32
    %7 = vector.broadcast %c15_i32 : i32 to vector<32x128xi32>
    %8 = arith.andi %6, %7 : vector<32x128xi32>
    %c0_3 = arith.constant 0 : index
    %c0_4 = arith.constant 0 : index
    %9 = vector.load %arg1[%c0_3, %c0_4] : memref<32x1xi32, #tpu.memory_space<vmem>>, vector<32x1xi32>
    %10 = vector.shape_cast %9 : vector<32x1xi32> to vector<32x1xi32>
    %11 = vector.broadcast %10 : vector<32x1xi32> to vector<32x128xi32>
    %c0_i32 = arith.constant 0 : i32
    %12 = vector.broadcast %c0_i32 : i32 to vector<32x128xi32>
    %13 = arith.cmpi eq, %11, %12 : vector<32x128xi32>
    %c0_5 = arith.constant 0 : index
    %c0_6 = arith.constant 0 : index
    %14 = vector.load %arg2[%c0_5, %c0_6] : memref<128x256xf32, #tpu.memory_space<vmem>>, vector<128x256xf32>
    %cst = arith.constant dense<0.000000e+00> : vector<32x256xf32>
    %15 = tpu.matmul %0, %14, %cst {dimension_numbers = #tpu.dot_dimension_numbers<[1], [0], [0], [1], [0, 0, 1, 1], [], []>} : vector<32x128xf32>, vector<128x256xf32>, vector<32x256xf32> -> vector<32x256xf32>
    %16 = vector.broadcast %2 : vector<1x256xf32> to vector<32x256xf32>
    %17 = arith.addf %15, %16 : vector<32x256xf32>
    %18 = vector.extract_strided_slice %17 {offsets = [0, 0], sizes = [32, 128], strides = [1, 1]} : vector<32x256xf32> to vector<32x128xf32>
    %19 = vector.extract_strided_slice %17 {offsets = [0, 128], sizes = [32, 128], strides = [1, 1]} : vector<32x256xf32> to vector<32x128xf32>
    %cst_7 = arith.constant 5.000000e-01 : f32
    %20 = vector.broadcast %cst_7 : f32 to vector<32x128xf32>
    %21 = arith.mulf %20, %18 : vector<32x128xf32>
    %cst_8 = arith.constant 4.471500e-02 : f32
    %22 = vector.broadcast %cst_8 : f32 to vector<32x128xf32>
    %23 = arith.mulf %22, %18 : vector<32x128xf32>
    %24 = arith.mulf %23, %18 : vector<32x128xf32>
    %25 = arith.mulf %24, %18 : vector<32x128xf32>
    %26 = arith.addf %18, %25 : vector<32x128xf32>
    %cst_9 = arith.constant 0.797884583 : f32
    %27 = vector.broadcast %cst_9 : f32 to vector<32x128xf32>
    %28 = arith.mulf %27, %26 : vector<32x128xf32>
    %29 = math.tanh %28 : vector<32x128xf32>
    %cst_10 = arith.constant 1.000000e+00 : f32
    %30 = vector.broadcast %cst_10 : f32 to vector<32x128xf32>
    %31 = arith.addf %30, %29 : vector<32x128xf32>
    %32 = arith.mulf %21, %31 : vector<32x128xf32>
    %33 = vector.extract_strided_slice %19 {offsets = [13, 0], sizes = [3, 128], strides = [1, 1]} : vector<32x128xf32> to vector<3x128xf32>
    %c0_11 = arith.constant 0 : index
    %c0_12 = arith.constant 0 : index
    %c0_13 = arith.constant 0 : index
    %34 = vector.load %arg7[%c0_11, %c0_12, %c0_13] : memref<2x3x128xf32, #tpu.memory_space<vmem>>, vector<1x3x128xf32>
    %35 = vector.shape_cast %34 : vector<1x3x128xf32> to vector<3x128xf32>
    %36 = vector.shape_cast %33 : vector<3x128xf32> to vector<1x3x128xf32>
    tpu.vector_store %arg7[%c0_11, %c0_12, %c0_13], %36 {strides = array<i32>} : memref<2x3x128xf32, #tpu.memory_space<vmem>>, vector<1x3x128xf32>,
    %37 = vector.extract_strided_slice %19 {offsets = [29, 0], sizes = [3, 128], strides = [1, 1]} : vector<32x128xf32> to vector<3x128xf32>
    %c1 = arith.constant 1 : index
    %c0_14 = arith.constant 0 : index
    %c0_15 = arith.constant 0 : index
    %38 = vector.load %arg7[%c1, %c0_14, %c0_15] : memref<2x3x128xf32, #tpu.memory_space<vmem>>, vector<1x3x128xf32>
    %39 = vector.shape_cast %38 : vector<1x3x128xf32> to vector<3x128xf32>
    %40 = vector.shape_cast %37 : vector<3x128xf32> to vector<1x3x128xf32>
    tpu.vector_store %arg7[%c1, %c0_14, %c0_15], %40 {strides = array<i32>} : memref<2x3x128xf32, #tpu.memory_space<vmem>>, vector<1x3x128xf32>,
    %41 = vector.extract_strided_slice %1 {offsets = [3, 0], sizes = [1, 128], strides = [1, 1]} : vector<8x256xf32> to vector<1x128xf32>
    %42 = vector.broadcast %41 : vector<1x128xf32> to vector<32x128xf32>
    %43 = arith.mulf %19, %42 : vector<32x128xf32>
    %44 = vector.broadcast %4 : vector<1x128xf32> to vector<32x128xf32>
    %45 = arith.addf %43, %44 : vector<32x128xf32>
    %c1_i32 = arith.constant 1 : i32
    %46 = tpu.dynamic_rotate %19 by %c1_i32 dim 0 : vector<32x128xf32>, i32 -> vector<32x128xf32>
    %c1_i32_16 = arith.constant 1 : i32
    %47 = vector.broadcast %c1_i32_16 : i32 to vector<32x128xi32>
    %48 = arith.cmpi sge, %8, %47 : vector<32x128xi32>
    %cst_17 = arith.constant 0.000000e+00 : f32
    %49 = vector.broadcast %cst_17 : f32 to vector<32x128xf32>
    %50 = arith.select %48, %46, %49 : vector<32x128xi1>, vector<32x128xf32>
    %51 = vector.extract_strided_slice %1 {offsets = [4, 0], sizes = [1, 128], strides = [1, 1]} : vector<8x256xf32> to vector<1x128xf32>
    %52 = vector.broadcast %51 : vector<1x128xf32> to vector<32x128xf32>
    %53 = arith.mulf %50, %52 : vector<32x128xf32>
    %54 = arith.addf %45, %53 : vector<32x128xf32>
    %c2_i32 = arith.constant 2 : i32
    %55 = tpu.dynamic_rotate %19 by %c2_i32 dim 0 : vector<32x128xf32>, i32 -> vector<32x128xf32>
    %c2_i32_18 = arith.constant 2 : i32
    %56 = vector.broadcast %c2_i32_18 : i32 to vector<32x128xi32>
    %57 = arith.cmpi sge, %8, %56 : vector<32x128xi32>
    %cst_19 = arith.constant 0.000000e+00 : f32
    %58 = vector.broadcast %cst_19 : f32 to vector<32x128xf32>
    %59 = arith.select %57, %55, %58 : vector<32x128xi1>, vector<32x128xf32>
    %60 = vector.extract_strided_slice %1 {offsets = [5, 0], sizes = [1, 128], strides = [1, 1]} : vector<8x256xf32> to vector<1x128xf32>
    %61 = vector.broadcast %60 : vector<1x128xf32> to vector<32x128xf32>
    %62 = arith.mulf %59, %61 : vector<32x128xf32>
    %63 = arith.addf %54, %62 : vector<32x128xf32>
    %c3_i32 = arith.constant 3 : i32
    %64 = tpu.dynamic_rotate %19 by %c3_i32 dim 0 : vector<32x128xf32>, i32 -> vector<32x128xf32>
    %c3_i32_20 = arith.constant 3 : i32
    %65 = vector.broadcast %c3_i32_20 : i32 to vector<32x128xi32>
    %66 = arith.cmpi sge, %8, %65 : vector<32x128xi32>
    %cst_21 = arith.constant 0.000000e+00 : f32
    %67 = vector.broadcast %cst_21 : f32 to vector<32x128xf32>
    %68 = arith.select %66, %64, %67 : vector<32x128xi1>, vector<32x128xf32>
    %69 = vector.extract_strided_slice %1 {offsets = [6, 0], sizes = [1, 128], strides = [1, 1]} : vector<8x256xf32> to vector<1x128xf32>
    %70 = vector.broadcast %69 : vector<1x128xf32> to vector<32x128xf32>
    %71 = arith.mulf %68, %70 : vector<32x128xf32>
    %72 = arith.addf %63, %71 : vector<32x128xf32>
    %c0_22 = arith.constant 0 : index
    %c0_23 = arith.constant 0 : index
    %73 = vector.load %arg3[%c0_22, %c0_23] : memref<128x256xf32, #tpu.memory_space<vmem>>, vector<128x256xf32>
    %cst_24 = arith.constant dense<0.000000e+00> : vector<32x256xf32>
    %74 = tpu.matmul %72, %73, %cst_24 {dimension_numbers = #tpu.dot_dimension_numbers<[1], [0], [0], [1], [0, 0, 1, 1], [], []>} : vector<32x128xf32>, vector<128x256xf32>, vector<32x256xf32> -> vector<32x256xf32>
    %75 = vector.broadcast %3 : vector<1x256xf32> to vector<32x256xf32>
    %76 = arith.addf %74, %75 : vector<32x256xf32>
    %77 = arith.negf %76 : vector<32x256xf32>
    %78 = math.exp %77 : vector<32x256xf32>
    %cst_25 = arith.constant 1.000000e+00 : f32
    %79 = vector.broadcast %cst_25 : f32 to vector<32x256xf32>
    %80 = arith.addf %79, %78 : vector<32x256xf32>
    %81 = arith.divf %79, %80 : vector<32x256xf32>
    %82 = vector.extract_strided_slice %81 {offsets = [0, 0], sizes = [32, 128], strides = [1, 1]} : vector<32x256xf32> to vector<32x128xf32>
    %83 = vector.extract_strided_slice %81 {offsets = [0, 128], sizes = [32, 128], strides = [1, 1]} : vector<32x256xf32> to vector<32x128xf32>
    %cst_26 = arith.constant -8.000000e+00 : f32
    %84 = vector.broadcast %cst_26 : f32 to vector<32x128xf32>
    %85 = arith.mulf %84, %83 : vector<32x128xf32>
    %86 = vector.broadcast %5 : vector<1x128xf32> to vector<32x128xf32>
    %87 = arith.mulf %85, %86 : vector<32x128xf32>
    %88 = math.exp %87 : vector<32x128xf32>
    %89 = arith.mulf %88, %88 : vector<32x128xf32>
    %cst_27 = arith.constant 1.000000e+00 : f32
    %90 = vector.broadcast %cst_27 : f32 to vector<32x128xf32>
    %91 = arith.subf %90, %89 : vector<32x128xf32>
    %92 = math.sqrt %91 : vector<32x128xf32>
    %cst_28 = arith.constant 1.000000e+00 : f32
    %93 = vector.broadcast %cst_28 : f32 to vector<32x128xf32>
    %94 = arith.select %13, %93, %92 : vector<32x128xi1>, vector<32x128xf32>
    %95 = arith.mulf %72, %82 : vector<32x128xf32>
    %96 = arith.mulf %95, %94 : vector<32x128xf32>
    %c0_i32_29 = arith.constant 0 : i32
    %97 = vector.broadcast %c0_i32_29 : i32 to vector<32x128xi32>
    %98 = arith.cmpi eq, %8, %97 : vector<32x128xi32>
    %99 = arith.ori %13, %98 : vector<32x128xi1>
    %cst_30 = arith.constant 0.000000e+00 : f32
    %100 = vector.broadcast %cst_30 : f32 to vector<32x128xf32>
    %101 = arith.select %99, %100, %88 : vector<32x128xi1>, vector<32x128xf32>
    %c1_i32_31 = arith.constant 1 : i32
    %102 = vector.broadcast %c1_i32_31 : i32 to vector<32x128xi32>
    %103 = arith.cmpi sge, %8, %102 : vector<32x128xi32>
    %c1_i32_32 = arith.constant 1 : i32
    %104 = tpu.dynamic_rotate %101 by %c1_i32_32 dim 0 : vector<32x128xf32>, i32 -> vector<32x128xf32>
    %cst_33 = arith.constant 1.000000e+00 : f32
    %105 = vector.broadcast %cst_33 : f32 to vector<32x128xf32>
    %106 = arith.select %103, %104, %105 : vector<32x128xi1>, vector<32x128xf32>
    %c1_i32_34 = arith.constant 1 : i32
    %107 = tpu.dynamic_rotate %96 by %c1_i32_34 dim 0 : vector<32x128xf32>, i32 -> vector<32x128xf32>
    %cst_35 = arith.constant 0.000000e+00 : f32
    %108 = vector.broadcast %cst_35 : f32 to vector<32x128xf32>
    %109 = arith.select %103, %107, %108 : vector<32x128xi1>, vector<32x128xf32>
    %110 = arith.mulf %101, %109 : vector<32x128xf32>
    %111 = arith.addf %110, %96 : vector<32x128xf32>
    %112 = arith.mulf %101, %106 : vector<32x128xf32>
    %c2_i32_36 = arith.constant 2 : i32
    %113 = vector.broadcast %c2_i32_36 : i32 to vector<32x128xi32>
    %114 = arith.cmpi sge, %8, %113 : vector<32x128xi32>
    %c2_i32_37 = arith.constant 2 : i32
    %115 = tpu.dynamic_rotate %112 by %c2_i32_37 dim 0 : vector<32x128xf32>, i32 -> vector<32x128xf32>
    %cst_38 = arith.constant 1.000000e+00 : f32
    %116 = vector.broadcast %cst_38 : f32 to vector<32x128xf32>
    %117 = arith.select %114, %115, %116 : vector<32x128xi1>, vector<32x128xf32>
    %c2_i32_39 = arith.constant 2 : i32
    %118 = tpu.dynamic_rotate %111 by %c2_i32_39 dim 0 : vector<32x128xf32>, i32 -> vector<32x128xf32>
    %cst_40 = arith.constant 0.000000e+00 : f32
    %119 = vector.broadcast %cst_40 : f32 to vector<32x128xf32>
    %120 = arith.select %114, %118, %119 : vector<32x128xi1>, vector<32x128xf32>
    %121 = arith.mulf %112, %120 : vector<32x128xf32>
    %122 = arith.addf %121, %111 : vector<32x128xf32>
    %123 = arith.mulf %112, %117 : vector<32x128xf32>
    %c4_i32 = arith.constant 4 : i32
    %124 = vector.broadcast %c4_i32 : i32 to vector<32x128xi32>
    %125 = arith.cmpi sge, %8, %124 : vector<32x128xi32>
    %c4_i32_41 = arith.constant 4 : i32
    %126 = tpu.dynamic_rotate %123 by %c4_i32_41 dim 0 : vector<32x128xf32>, i32 -> vector<32x128xf32>
    %cst_42 = arith.constant 1.000000e+00 : f32
    %127 = vector.broadcast %cst_42 : f32 to vector<32x128xf32>
    %128 = arith.select %125, %126, %127 : vector<32x128xi1>, vector<32x128xf32>
    %c4_i32_43 = arith.constant 4 : i32
    %129 = tpu.dynamic_rotate %122 by %c4_i32_43 dim 0 : vector<32x128xf32>, i32 -> vector<32x128xf32>
    %cst_44 = arith.constant 0.000000e+00 : f32
    %130 = vector.broadcast %cst_44 : f32 to vector<32x128xf32>
    %131 = arith.select %125, %129, %130 : vector<32x128xi1>, vector<32x128xf32>
    %132 = arith.mulf %123, %131 : vector<32x128xf32>
    %133 = arith.addf %132, %122 : vector<32x128xf32>
    %134 = arith.mulf %123, %128 : vector<32x128xf32>
    %c8_i32 = arith.constant 8 : i32
    %135 = vector.broadcast %c8_i32 : i32 to vector<32x128xi32>
    %136 = arith.cmpi sge, %8, %135 : vector<32x128xi32>
    %c8_i32_45 = arith.constant 8 : i32
    %137 = tpu.dynamic_rotate %133 by %c8_i32_45 dim 0 : vector<32x128xf32>, i32 -> vector<32x128xf32>
    %cst_46 = arith.constant 0.000000e+00 : f32
    %138 = vector.broadcast %cst_46 : f32 to vector<32x128xf32>
    %139 = arith.select %136, %137, %138 : vector<32x128xi1>, vector<32x128xf32>
    %140 = arith.mulf %134, %139 : vector<32x128xf32>
    %141 = arith.addf %140, %133 : vector<32x128xf32>
    %c0_47 = arith.constant 0 : index
    %c0_48 = arith.constant 0 : index
    %142 = vector.load %arg6[%c0_47, %c0_48] : memref<32x128xf32, #tpu.memory_space<vmem>>, vector<32x128xf32>
    tpu.vector_store %arg6[%c0_47, %c0_48], %141 {strides = array<i32>} : memref<32x128xf32, #tpu.memory_space<vmem>>, vector<32x128xf32>,
    %143 = arith.mulf %141, %32 : vector<32x128xf32>
    %c0_49 = arith.constant 0 : index
    %c0_50 = arith.constant 0 : index
    %144 = vector.load %arg5[%c0_49, %c0_50] : memref<32x128xf32, #tpu.memory_space<vmem>>, vector<32x128xf32>
    tpu.vector_store %arg5[%c0_49, %c0_50], %143 {strides = array<i32>} : memref<32x128xf32, #tpu.memory_space<vmem>>, vector<32x128xf32>,
    return
  }
}

</mosaic_0001>

<bundles_post_ra>
// kernel: tpu_custom_call.1
= control target key start
LH: loop header
LB: loop body
LE: loop exit
PB: predicated region body
PF: predicated region fallthrough
CT: control target
= control target key end

     0   :  { %13 = vsyncpa [#allocation3], 0  ;;  %s1577_s0 = inlined_call_operand.vmem [shape: f32[32,128], index: 0, kind: input, shape index: {}]   ;;  %s1578_s1 = inlined_call_operand.vmem [shape: s32[32,1], index: 1, kind: input, shape index: {}]   ;;  %s1579_s2 = inlined_call_operand.hbm [shape: f32[128,256], index: 2, kind: input, shape index: {}]   ;;  %s1580_s3 = inlined_call_operand.hbm [shape: f32[128,256], index: 3, kind: input, shape index: {}]   ;;  %s1581_s4 = inlined_call_operand.vmem [shape: f32[8,256], index: 4, kind: input, shape index: {}]   ;;  %s1582_s5 = inlined_call_operand.hbm [shape: f32[32,128], index: 5, kind: output, shape index: {0}]   ;;  %s1583_s6 = inlined_call_operand.hbm [shape: f32[32,128], index: 6, kind: output, shape index: {1}]   ;;  %s1584_s7 = inlined_call_operand.vmem [shape: f32[2,3,128], index: 7, kind: output, shape index: {2}]  }
   0x1   :  { %14 = vsyncpa [#allocation6], 0 }
   0x2   :  { %15 = vsyncpa [#allocation4], 0 }
   0x3   :  { %16 = vsyncpa [#allocation9], 0  ;;  %s1032_s24 = smov [#allocation2]   ;;  %s936_s28 = scalar_lea.hbm %s1579_s2, 4096 }
   0x4   :  { %s26_s25 = sshll.u32 %s1032_s24, 4  ;;  %p937_p0 = scmp.ne.s32.totalorder %s1579_s2, %s936_s28  ;;  %s27_s25 = int_to_ptr.vmem [resolvable:$true] %s26_s25 }
   0x5   :  { %p940_p1 = scmp.lt.u32.totalorder %s936_s28, %s1579_s2 }
   0x7   :  { %p942_p2 = pnand %p940_p1, %p937_p0 }
   0x9   :  { %945 = shalt.err (!%p942_p2)
}
   0xa   :  { %s946_s10 = scalar_lea.vmem %s27_s25, 4096  ;;  %p951_p4 = scmp.lt.s32.totalorder %s27_s25, %s27_s25 }
   0xb   :  { %p947_p3 = scmp.ne.s32.totalorder %s27_s25, %s946_s10  ;;  %p952_p5 = scmp.lt.s32.totalorder %s946_s10, %s946_s10 }
   0xd   :  { %p953_p6 = por %p952_p5, %p951_p4 }
   0xf   :  { %p954_p7 = pnand %p953_p6, %p947_p3 }
  0x11   :  { %957 = shalt.err (!%p954_p7)
}
  0x12   :  { %s1033_s11 = smov 256   ;;  %s1034_s12 = smov 16  }
  0x13   :  { %32 = dma.hbm_to_vmem [thread:$0]  %s1579_s2, 4096, %s27_s25, [#allocation3], %s1033_s11, %s1033_s11, %s1034_s12  }
  0x14   :  { %s1035_s15 = smov [#allocation5]   ;;  %s958_s19 = scalar_lea.hbm %s1580_s3, 4096 }
  0x15   :  { %s38_s16 = sshll.u32 %s1035_s15, 4  ;;  %p959_p8 = scmp.ne.s32.totalorder %s1580_s3, %s958_s19  ;;  %s39_s16 = int_to_ptr.vmem [resolvable:$true] %s38_s16 }
  0x16   :  { %p962_p9 = scmp.lt.u32.totalorder %s958_s19, %s1580_s3 }
  0x18   :  { %p964_p10 = pnand %p962_p9, %p959_p8 }
  0x1a   :  { %967 = shalt.err (!%p964_p10)
}
  0x1b   :  { %s968_s24 = scalar_lea.vmem %s39_s16, 4096  ;;  %p973_p12 = scmp.lt.s32.totalorder %s39_s16, %s39_s16 }
  0x1c   :  { %p969_p11 = scmp.ne.s32.totalorder %s39_s16, %s968_s24  ;;  %p974_p13 = scmp.lt.s32.totalorder %s968_s24, %s968_s24 }
  0x1e   :  { %p975_p0 = por %p974_p13, %p973_p12 }
  0x20   :  { %p976_p1 = pnand %p975_p0, %p969_p11 }
  0x22   :  { %979 = shalt.err (!%p976_p1)
}
  0x23   :  { %44 = dma.hbm_to_vmem [thread:$0]  %s1580_s3, 4096, %s39_s16, [#allocation6], %s1033_s11, %s1033_s11, %s1034_s12  }
  0x24   :  { %1024 = dma.done.wait [#allocation3], 4096  }
  0x25   :  { %1025 = vsyncadd [#allocation3], 4294963200 }
  0x26   :  { %1026 = dma.done.wait [#allocation6], 4096  }
  0x27   :  { %1027 = vsyncadd [#allocation6], 4294963200  ;;  %v1036_v0 = vmov 0.0   ;;  %v89_v1 = vld [vmem:[#allocation2 + $0x8] sm:$0xff]  ;;  %v91_v2 = vld [vmem:[#allocation2 + $0x18] sm:$0xff]  ;;  %s1039_s24 = smov [#allocation7]  }
  0x28   :  { %192 = vmatprep.mubr.f32.mxu0 %v1036_v0  ;;  %463 = vmatprep.mubr.f32.mxu1 %v1036_v0  ;;  %v88_v3 = vld [vmem:[#allocation2] sm:$0xff]  ;;  %v804_v4 = vpack.c.bf16 %v91_v2, %v89_v1  ;;  %v90_v5 = vld [vmem:[#allocation2 + $0x10] sm:$0xff]  ;;  %v93_v6 = vld [vmem:[#allocation2 + $0x28] sm:$0xff]  ;;  %s762_s2 = sshll.u32 %s1039_s24, 4  ;;  %s1546_s2 = int_to_ptr.vmem [resolvable:$true] %s762_s2 }
  0x29   :  { %v95_v7 = vld [vmem:[#allocation2 + $0x38] sm:$0xff]  ;;  %v806_v8 = vpack.c.bf16 %v90_v5, %v88_v3  ;;  %v92_v10 = vld [vmem:[#allocation2 + $0x20] sm:$0xff]  ;;  %v94_v11 = vld [vmem:[#allocation2 + $0x30] sm:$0xff] }
  0x2a   :  { %v808_v9 = vpack.c.bf16 %v95_v7, %v93_v6  ;;  %v97_v12 = vld [vmem:[#allocation2 + $0x48] sm:$0xff]  ;;  %805 = vmatprep.subr.bf16.mxu0 %v804_v4  ;;  %v99_v13 = vld [vmem:[#allocation2 + $0x58] sm:$0xff]  ;;  %v810_v14 = vpack.c.bf16 %v94_v11, %v92_v10  ;;  %v96_v16 = vld [vmem:[#allocation2 + $0x40] sm:$0xff] }
  0x2b   :  { %807 = vmatpush1.bf16.msra.mxu0 %v806_v8  ;;  %v812_v15 = vpack.c.bf16 %v99_v13, %v97_v12  ;;  %v98_v17 = vld [vmem:[#allocation2 + $0x50] sm:$0xff]  ;;  %v101_v18 = vld [vmem:[#allocation2 + $0x68] sm:$0xff]  ;;  %v103_v19 = vld [vmem:[#allocation2 + $0x78] sm:$0xff] }
  0x2c   :  { %809 = vmatprep.subr.bf16.mxu0 %v808_v9  ;;  %v814_v20 = vpack.c.bf16 %v98_v17, %v96_v16  ;;  %v816_v21 = vpack.c.bf16 %v103_v19, %v101_v18  ;;  %v100_v22 = vld [vmem:[#allocation2 + $0x60] sm:$0xff]  ;;  %v102_v23 = vld [vmem:[#allocation2 + $0x70] sm:$0xff]  ;;  %v105_v24 = vld [vmem:[#allocation2 + $0x88] sm:$0xff] }
  0x2d   :  { %v107_v25 = vld [vmem:[#allocation2 + $0x98] sm:$0xff]  ;;  %v818_v26 = vpack.c.bf16 %v102_v23, %v100_v22  ;;  %v360_v27 = vld [vmem:[#allocation5 + $0x8] sm:$0xff]  ;;  %v359_v29 = vld [vmem:[#allocation5] sm:$0xff] }
  0x2e   :  { %v362_v28 = vld [vmem:[#allocation5 + $0x18] sm:$0xff]  ;;  %v820_v30 = vpack.c.bf16 %v107_v25, %v105_v24  ;;  %v104_v31 = vld [vmem:[#allocation2 + $0x80] sm:$0xff]  ;;  %v106_v32 = vld [vmem:[#allocation2 + $0x90] sm:$0xff] }
  0x2f   :  { %811 = vmatpush1.bf16.msra.mxu0 %v810_v14  ;;  %v836_v33 = vpack.c.bf16 %v362_v28, %v360_v27  ;;  %v361_v34 = vld [vmem:[#allocation5 + $0x10] sm:$0xff]  ;;  %v109_v35 = vld [vmem:[#allocation2 + $0xa8] sm:$0xff]  ;;  %v111_v36 = vld [vmem:[#allocation2 + $0xb8] sm:$0xff]  ;;  %v822_v38 = vpack.c.bf16 %v106_v32, %v104_v31 }
  0x30   :  { %813 = vmatprep.subr.bf16.mxu0 %v812_v15  ;;  %v838_v37 = vpack.c.bf16 %v361_v34, %v359_v29  ;;  %v824_v39 = vpack.c.bf16 %v111_v36, %v109_v35  ;;  %v108_v40 = vld [vmem:[#allocation2 + $0xa0] sm:$0xff]  ;;  %v110_v41 = vld [vmem:[#allocation2 + $0xb0] sm:$0xff]  ;;  %v113_v42 = vld [vmem:[#allocation2 + $0xc8] sm:$0xff] }
  0x31   :  { %837 = vmatprep.subr.bf16.mxu1 %v836_v33  ;;  %v115_v43 = vld [vmem:[#allocation2 + $0xd8] sm:$0xff]  ;;  %v826_v44 = vpack.c.bf16 %v110_v41, %v108_v40  ;;  %v112_v46 = vld [vmem:[#allocation2 + $0xc0] sm:$0xff]  ;;  %v114_v47 = vld [vmem:[#allocation2 + $0xd0] sm:$0xff]  ;;  %v1037_v40 = vmov 0  }
  0x32   :  { %839 = vmatpush1.bf16.msra.mxu1 %v838_v37  ;;  %v828_v45 = vpack.c.bf16 %v115_v43, %v113_v42  ;;  %v117_v48 = vld [vmem:[#allocation2 + $0xe8] sm:$0xff]  ;;  %v119_v49 = vld [vmem:[#allocation2 + $0xf8] sm:$0xff]  ;;  %v830_v50 = vpack.c.bf16 %v114_v47, %v112_v46  ;;  %v116_v52 = vld [vmem:[#allocation2 + $0xe0] sm:$0xff]  ;;  %878 = vset.pattern.permute.xlu0 %v1037_v40  ;;  %v59_v43 = vlaneseq }
  0x33   :  { %815 = vmatpush1.bf16.msra.mxu0 %v814_v20  ;;  %v832_v51 = vpack.c.bf16 %v119_v49, %v117_v48  ;;  %v118_v53 = vld [vmem:[#allocation2 + $0xf0] sm:$0xff]  ;;  %v53_v55 = vld [vmem:[%s1577_s0] sm:$0xff]  ;;  %v54_v56 = vld [vmem:[%s1577_s0 + $0x8] sm:$0xff]  ;;  %879 = vset.pattern.permute.xlu1 %v1037_v40 }
  0x34   :  { %817 = vmatprep.subr.bf16.mxu0 %v816_v21  ;;  %v834_v54 = vpack.c.bf16 %v118_v53, %v116_v52  ;;  %v55_v57 = vld [vmem:[%s1577_s0 + $0x10] sm:$0xff]  ;;  %v56_v58 = vld [vmem:[%s1577_s0 + $0x18] sm:$0xff]  ;;  %v364_v59 = vld [vmem:[#allocation5 + $0x28] sm:$0xff] }
  0x35   :  { %v366_v60 = vld [vmem:[#allocation5 + $0x38] sm:$0xff]  ;;  %v363_v62 = vld [vmem:[#allocation5 + $0x20] sm:$0xff]  ;;  %v365_v63 = vld [vmem:[#allocation5 + $0x30] sm:$0xff] }
  0x36   :  { %v840_v61 = vpack.c.bf16 %v366_v60, %v364_v59  ;;  %v842_v1 = vpack.c.bf16 %v365_v63, %v363_v62  ;;  %v368_v2 = vld [vmem:[#allocation5 + $0x48] sm:$0xff]  ;;  %v370_v3 = vld [vmem:[#allocation5 + $0x58] sm:$0xff]  ;;  %v367_v5 = vld [vmem:[#allocation5 + $0x40] sm:$0xff] }
  0x37   :  { %819 = vmatpush1.bf16.msra.mxu0 %v818_v26  ;;  %v844_v4 = vpack.c.bf16 %v370_v3, %v368_v2  ;;  %v369_v6 = vld [vmem:[#allocation5 + $0x50] sm:$0xff]  ;;  %v372_v8 = vld [vmem:[#allocation5 + $0x68] sm:$0xff]  ;;  %v374_v9 = vld [vmem:[#allocation5 + $0x78] sm:$0xff] }
  0x38   :  { %821 = vmatprep.subr.bf16.mxu0 %v820_v30  ;;  %841 = vmatprep.subr.bf16.mxu1 %v840_v61  ;;  %v846_v7 = vpack.c.bf16 %v369_v6, %v367_v5  ;;  %v848_v10 = vpack.c.bf16 %v374_v9, %v372_v8  ;;  %v371_v11 = vld [vmem:[#allocation5 + $0x60] sm:$0xff]  ;;  %v373_v12 = vld [vmem:[#allocation5 + $0x70] sm:$0xff]  ;;  %v376_v14 = vld [vmem:[#allocation5 + $0x88] sm:$0xff] }
  0x39   :  { %843 = vmatpush1.bf16.msra.mxu1 %v842_v1  ;;  %v850_v13 = vpack.c.bf16 %v373_v12, %v371_v11  ;;  %v378_v15 = vld [vmem:[#allocation5 + $0x98] sm:$0xff]  ;;  %v375_v17 = vld [vmem:[#allocation5 + $0x80] sm:$0xff]  ;;  %v377_v18 = vld [vmem:[#allocation5 + $0x90] sm:$0xff] }
  0x3a   :  { %845 = vmatprep.subr.bf16.mxu1 %v844_v4  ;;  %v852_v16 = vpack.c.bf16 %v378_v15, %v376_v14  ;;  %v854_v19 = vpack.c.bf16 %v377_v18, %v375_v17  ;;  %v380_v20 = vld [vmem:[#allocation5 + $0xa8] sm:$0xff]  ;;  %v382_v21 = vld [vmem:[#allocation5 + $0xb8] sm:$0xff]  ;;  %v379_v23 = vld [vmem:[#allocation5 + $0xa0] sm:$0xff] }
  0x3b   :  { %823 = vmatpush1.bf16.msra.mxu0 %v822_v38  ;;  %v856_v22 = vpack.c.bf16 %v382_v21, %v380_v20  ;;  %v381_v24 = vld [vmem:[#allocation5 + $0xb0] sm:$0xff]  ;;  %v384_v26 = vld [vmem:[#allocation5 + $0xc8] sm:$0xff]  ;;  %v386_v27 = vld [vmem:[#allocation5 + $0xd8] sm:$0xff] }
  0x3c   :  { %825 = vmatprep.subr.bf16.mxu0 %v824_v39  ;;  %v858_v25 = vpack.c.bf16 %v381_v24, %v379_v23  ;;  %v860_v28 = vpack.c.bf16 %v386_v27, %v384_v26  ;;  %v383_v29 = vld [vmem:[#allocation5 + $0xc0] sm:$0xff]  ;;  %v385_v30 = vld [vmem:[#allocation5 + $0xd0] sm:$0xff]  ;;  %v388_v32 = vld [vmem:[#allocation5 + $0xe8] sm:$0xff] }
  0x3d   :  { %847 = vmatpush1.bf16.msra.mxu1 %v846_v7  ;;  %v862_v31 = vpack.c.bf16 %v385_v30, %v383_v29  ;;  %v390_v33 = vld [vmem:[#allocation5 + $0xf8] sm:$0xff]  ;;  %v387_v35 = vld [vmem:[#allocation5 + $0xe0] sm:$0xff]  ;;  %v389_v36 = vld [vmem:[#allocation5 + $0xf0] sm:$0xff] }
  0x3e   :  { %849 = vmatprep.subr.bf16.mxu1 %v848_v10  ;;  %v864_v34 = vpack.c.bf16 %v390_v33, %v388_v32  ;;  %v866_v37 = vpack.c.bf16 %v389_v36, %v387_v35  ;;  %v68_v38 = vld [vmem:[%s1578_s1] sm:$0xff]  ;;  %v70_v39 = vld [vmem:[%s1578_s1 + $0x10] sm:$0xff]  ;;  %v69_v41 = vld [vmem:[%s1578_s1 + $0x8] sm:$0xff] }
  0x3f   :  { %827 = vmatpush1.bf16.msra.mxu0 %v826_v44  ;;  %73 = vperm.xlu0 %878, %v68_v38   ;;  %v71_v42 = vld [vmem:[%s1578_s1 + $0x18] sm:$0xff]  ;;  %v1135_v44 = vshrl.u32 %v59_v43, 7  ;;  %v1141_v46 = vld [vmem:[%s1581_s4 + $0x8] sm:$0xff]  ;;  %v1154_v53 = vld [vmem:[%s1581_s4] sm:$0xff] }
  0x40   :  { %829 = vmatprep.subr.bf16.mxu0 %v828_v45  ;;  %79 = vperm.xlu1 %879, %v70_v39  }
  0x41   :  { %851 = vmatpush1.bf16.msra.mxu1 %v850_v13  ;;  %v122_v45 = vsub.s32 0, %v1135_v44  ;;  %vm276_vm0 = vcmp.lt.s32.totalorder %v1135_v44, 1  ;;  %vm305_vm1 = vcmp.lt.s32.totalorder %v1135_v44, 2  ;;  %v320_v60 = vsub.s32 5, %v1135_v44 }
  0x42   :  { %853 = vmatprep.subr.bf16.mxu1 %v852_v16  ;;  %v1182_v5 = vand.u32 15, %v1135_v44  ;;  %v349_v6 = vsub.s32 6, %v1135_v44  ;;  %vm334_vm2 = vcmp.lt.s32.totalorder %v1135_v44, 3  ;;  %v62_v12 = vadd.s32 16, %v1135_v44 }
  0x43   :  { %831 = vmatpush1.bf16.msra.mxu0 %v830_v50  ;;  %76 = vperm.xlu0 %878, %v69_v41   ;;  %v127_v47 = vrot.slane %v1141_v46, %v122_v45  ;;  %v258_v50 = vsub.s32 3, %v1135_v44  ;;  %v1192_v11 = vrot.slane %v1154_v53, %v320_v60 }
  0x44   :  { %833 = vmatprep.subr.bf16.mxu0 %v832_v51  ;;  %82 = vperm.xlu1 %879, %v71_v42   ;;  %vm281_vm3 = vcmp.ge.s32.totalorder %v1182_v5, 1  ;;  %v350_v18 = vrot.slane %v1154_v53, %v349_v6  ;;  %vm310_vm4 = vcmp.ge.s32.totalorder %v1182_v5, 2  ;;  %vm339_vm5 = vcmp.ge.s32.totalorder %v1182_v5, 3 }
  0x45   :  { %855 = vmatpush1.bf16.msra.mxu1 %v854_v19  ;;  %v1207_v24 = vand.u32 15, %v62_v12  ;;  %vm604_vm9 = vcmp.eq.s32.totalorder %v1182_v5, 0 }
  0x46   :  { %857 = vmatprep.subr.bf16.mxu1 %v856_v22 }
  0x47   :  { %835 = vmatpush1.bf16.msra.mxu0 %v834_v54  ;;  %v266_v54 = vsub.s32 2, %v1135_v44  ;;  %vm283_vm6 = vcmp.ge.s32.totalorder %v1207_v24, 1  ;;  %vm312_vm7 = vcmp.ge.s32.totalorder %v1207_v24, 2  ;;  %vm341_vm8 = vcmp.ge.s32.totalorder %v1207_v24, 3 }
  0x48   :  { %vm606_vm13 = vcmp.eq.s32.totalorder %v1207_v24, 0 }
  0x49   :  { %859 = vmatpush1.bf16.msra.mxu1 %v858_v25  ;;  %v1179_v3 = vrot.slane %v1154_v53, %v266_v54 }
  0x4a   :  { %193 = vmatmul.mubr.f32.vlgmr.msra.gmra.mrb[0].mxu0 %v53_v55  ;;  %861 = vmatprep.subr.bf16.mxu1 %v860_v28 }
  0x4b   :  { %198 = vmatprep.mubr.f32.mxu0 %v1036_v0 }
  0x4d   :  { %863 = vmatpush1.bf16.msra.mxu1 %v862_v31 }
  0x4e   :  { %199 = vmatmul.mubr.f32.gmra.mrb[2].mxu0 %v54_v56  ;;  %865 = vmatprep.subr.bf16.mxu1 %v864_v34  ;;  %v1158_v56 = vrot.slane %v1154_v53, %v258_v50 }
  0x4f   :  { %204 = vmatprep.mubr.f32.mxu0 %v1036_v0 }
  0x51   :  { %867 = vmatpush1.bf16.msra.mxu1 %v866_v37 }
  0x52   :  { %205 = vmatmul.mubr.f32.gmra.mrb[4].mxu0 %v55_v57 }
  0x53   :  { %210 = vmatprep.mubr.f32.mxu0 %v1036_v0 }
  0x56   :  { %211 = vmatmul.mubr.f32.gmra.mrb[6].mxu0 %v56_v58  ;;  %v291_v58 = vsub.s32 4, %v1135_v44 }
  0x58   :  { %v292_v7 = vrot.slane %v1154_v53, %v291_v58 }
 0x11d   :  { %v1146_v48 = vpop.f32.mrb[0].mxu0 }
 0x11e   :  { %v196_v49 = vpop.f32.mrb[1].mxu0 }
 0x11f   :  { %v197_v51 = vadd.f32 %v196_v49, %v127_v47 }
 0x121   :  { %v1149_v52 = vpop.f32.mrb[2].mxu0  ;;  %v272_v59 = vrot.slane %v197_v51, 7  ;;  %v301_v61 = vrot.slane %v197_v51, 6  ;;  %v330_v13 = vrot.slane %v197_v51, 5  ;;  %v260_v22 = vmul.f32 %v1158_v56, %v197_v51 }
 0x122   :  { %v202_v55 = vpop.f32.mrb[3].mxu0 }
 0x123   :  { %v1160_v57 = vadd.f32 %v202_v55, %v127_v47  ;;  %v268_v40 = vadd.f32 %v1179_v3, %v260_v22  ;;  %v393_v22 = vsub.s32 1, %v1135_v44 }
 0x125   :  { %253 = vst [vmem:[%s1584_s7 - $0x5] sm:$0xe0] %v1160_v57  ;;  %v273_v62 = vrot.slane %v1160_v57, 7  ;;  %v302_v63 = vrot.slane %v1160_v57, 6  ;;  %v1172_v1 = vpop.f32.mrb[4].mxu0  ;;  %v261_v2 = vmul.f32 %v1158_v56, %v1160_v57  ;;  %v331_v10 = vrot.slane %v1160_v57, 5 }
 0x126   :  { %v208_v4 = vpop.f32.mrb[5].mxu0 }
 0x127   :  { %v279_v8 = vsel %vm276_vm0, %v272_v59, %v273_v62  ;;  %v308_v9 = vsel %vm305_vm1, %v301_v61, %v302_v63  ;;  %v269_v15 = vadd.f32 %v1179_v3, %v261_v2  ;;  %v209_v16 = vadd.f32 %v208_v4, %v127_v47 }
 0x128   :  { %v294_v20 = vmul.f32 %v292_v7, %v279_v8  ;;  %v337_v21 = vsel %vm334_vm2, %v330_v13, %v331_v10  ;;  %v323_v23 = vmul.f32 %v1192_v11, %v308_v9 }
 0x129   :  { %v1196_v14 = vpop.f32.mrb[6].mxu0  ;;  %v274_v29 = vrot.slane %v209_v16, 7  ;;  %v303_v30 = vrot.slane %v209_v16, 6  ;;  %v332_v31 = vrot.slane %v209_v16, 5  ;;  %v352_v32 = vmul.f32 %v350_v18, %v337_v21 }
 0x12a   :  { %v214_v17 = vpop.f32.mrb[7].mxu0  ;;  %v298_v28 = vadd.f32 %v294_v20, %v269_v15  ;;  %v262_v39 = vmul.f32 %v1158_v56, %v209_v16 }
 0x12b   :  { %v215_v19 = vadd.f32 %v214_v17, %v127_v47  ;;  %v278_v50 = vsel %vm276_vm0, %v273_v62, %v274_v29  ;;  %v307_v51 = vsel %vm305_vm1, %v302_v63, %v303_v30  ;;  %v336_v55 = vsel %vm334_vm2, %v331_v10, %v332_v31 }
 0x12c   :  { %v327_v36 = vadd.f32 %v323_v23, %v298_v28  ;;  %v287_v57 = vsel %vm283_vm6, %v278_v50, 0.0  ;;  %v316_v58 = vsel %vm312_vm7, %v307_v51, 0.0  ;;  %v345_v4 = vsel %vm341_vm8, %v336_v55, 0.0 }
 0x12d   :  { %795 = vst [vmem:[%s1584_s7 - $0x1] sm:$0xe0] %v215_v19  ;;  %v275_v25 = vrot.slane %v215_v19, 7  ;;  %v304_v26 = vrot.slane %v215_v19, 6  ;;  %v333_v27 = vrot.slane %v215_v19, 5  ;;  %v295_v2 = vmul.f32 %v292_v7, %v287_v57  ;;  %s1038_s7 = smov [#allocation8]  }
 0x12e   :  { %v1226_v42 = vadd.f32 %v352_v32, %v327_v36  ;;  %v263_v62 = vmul.f32 %v1158_v56, %v215_v19  ;;  %v324_v9 = vmul.f32 %v1192_v11, %v316_v58  ;;  %v353_v16 = vmul.f32 %v350_v18, %v345_v4  ;;  %s774_s23 = sshll.u32 %s1038_s7, 4  ;;  %s775_s23 = int_to_ptr.vmem [resolvable:$true] %s774_s23 }
 0x12f   :  { %v280_v33 = vsel %vm276_vm0, %v275_v25, %v272_v59  ;;  %v309_v34 = vsel %vm305_vm1, %v304_v26, %v301_v61  ;;  %v338_v35 = vsel %vm334_vm2, %v333_v27, %v330_v13  ;;  %v270_v61 = vadd.f32 %v1179_v3, %v262_v39  ;;  %s980_s25 = scalar_lea.vmem %s775_s23, 512  ;;  %p985_p3 = scmp.lt.s32.totalorder %s775_s23, %s775_s23 }
 0x130   :  { %v285_v37 = vsel %vm281_vm3, %v280_v33, 0.0  ;;  %v314_v38 = vsel %vm310_vm4, %v309_v34, 0.0  ;;  %v343_v47 = vsel %vm339_vm5, %v338_v35, 0.0  ;;  %v277_v63 = vsel %vm276_vm0, %v274_v29, %v275_v25  ;;  %p981_p2 = scmp.ne.s32.totalorder %s775_s23, %s980_s25  ;;  %p986_p4 = scmp.lt.s32.totalorder %s980_s25, %s980_s25 }
 0x131   :  { %v293_v41 = vmul.f32 %v292_v7, %v285_v37  ;;  %v322_v43 = vmul.f32 %v1192_v11, %v314_v38  ;;  %v351_v60 = vmul.f32 %v350_v18, %v343_v47  ;;  %v299_v8 = vadd.f32 %v295_v2, %v270_v61 }
 0x132   :  { %v296_v10 = vmul.f32 %v292_v7, %v277_v63  ;;  %v271_v12 = vadd.f32 %v1179_v3, %v263_v62  ;;  %v306_v13 = vsel %vm305_vm1, %v303_v30, %v304_v26  ;;  %v335_v15 = vsel %vm334_vm2, %v332_v31, %v333_v27  ;;  %p987_p5 = por %p986_p4, %p985_p3 }
 0x133   :  { %v297_v49 = vadd.f32 %v293_v41, %v268_v40  ;;  %v328_v56 = vadd.f32 %v324_v9, %v299_v8  ;;  %v325_v19 = vmul.f32 %v1192_v11, %v306_v13  ;;  %v354_v21 = vmul.f32 %v350_v18, %v335_v15 }
 0x134   :  { %v300_v17 = vadd.f32 %v296_v10, %v271_v12  ;;  %v398_v11 = vrot.slane %v1141_v46, %v393_v22  ;;  %v394_v39 = vrot.slane %v1154_v53, %v393_v22  ;;  %v543_v61 = vrot.slane %v1141_v46, %v266_v54  ;;  %p988_p6 = pnand %p987_p5, %p981_p2 }
 0x135   :  { %v326_v59 = vadd.f32 %v322_v43, %v297_v49  ;;  %v1257_v20 = vadd.f32 %v353_v16, %v328_v56  ;;  %v123_v22 = vrot.slane %v1154_v53, %v122_v45 }
 0x136   :  { %v329_v7 = vadd.f32 %v325_v19, %v300_v17 }
 0x137   :  { %v1246_v6 = vadd.f32 %v351_v60, %v326_v59 }
 0x138   :  { %v1261_v3 = vadd.f32 %v354_v21, %v329_v7  ;;  %v1272_v7 = vpop.permute.xlu0 %73 }
 0x139   :  { %464 = vmatmul.mubr.f32.vlgmr.msra.gmra.mrb[0].mxu1 %v1246_v6  ;;  %vm84_vm10 = vcmp.eq.s32.totalorder %v1272_v7, 0 }
 0x13a   :  { %469 = vmatprep.mubr.f32.mxu1 %v1036_v0  ;;  %vm608_vm11 = vmor %vm84_vm10, %vm604_vm9 }
 0x13c   :  { %v1285_v53 = vpop.permute.xlu0 %76 }
 0x13d   :  { %470 = vmatmul.mubr.f32.gmra.mrb[2].mxu1 %v1226_v42  ;;  %vm85_vm12 = vcmp.eq.s32.totalorder %v1285_v53, 0 }
 0x13e   :  { %475 = vmatprep.mubr.f32.mxu1 %v1036_v0 }
 0x141   :  { %476 = vmatmul.mubr.f32.gmra.mrb[4].mxu1 %v1257_v20 }
 0x142   :  { %481 = vmatprep.mubr.f32.mxu1 %v1036_v0 }
 0x145   :  { %482 = vmatmul.mubr.f32.gmra.mrb[6].mxu1 %v1261_v3 }
 0x20c   :  { %v465_v23 = vpop.f32.mrb[0].mxu1 }
 0x20d   :  { %v467_v25 = vpop.f32.mrb[1].mxu1  ;;  %v466_v43 = vadd.f32 %v465_v23, %v394_v39 }
 0x20e   :  { %v468_v26 = vadd.f32 %v467_v25, %v398_v11 }
 0x20f   :  { %v796_v55 = vmul.f32 -1.442695, %v466_v43 }
 0x210   :  { %v797_v18 = vmul.f32 -1.442695, %v468_v26  ;;  %v471_v27 = vpop.f32.mrb[2].mxu1 }
 0x211   :  { %v473_v28 = vpop.f32.mrb[3].mxu1  ;;  %v472_v49 = vadd.f32 %v471_v27, %v394_v39 }
 0x212   :  { %880 = vpow2.f32 %v797_v18  ;;  %v474_v29 = vadd.f32 %v473_v28, %v398_v11 }
 0x213   :  { %v798_v58 = vmul.f32 -1.442695, %v472_v49 }
 0x214   :  { %v799_v30 = vmul.f32 -1.442695, %v474_v29  ;;  %v477_v31 = vpop.f32.mrb[4].mxu1  ;;  %v1278_v29 = vadd.f32 %v1146_v48, %v123_v22  ;;  %v1293_v48 = vadd.f32 %v1196_v14, %v123_v22 }
 0x215   :  { %v479_v32 = vpop.f32.mrb[5].mxu1  ;;  %v478_v50 = vadd.f32 %v477_v31, %v394_v39  ;;  %v1283_v31 = vadd.f32 %v1149_v52, %v123_v22 }
 0x216   :  { %882 = vpow2.f32 %v799_v30  ;;  %v480_v33 = vadd.f32 %v479_v32, %v398_v11  ;;  %v1288_v32 = vadd.f32 %v1172_v1, %v123_v22  ;;  %v221_v52 = vmul.f32 0.044715, %v1278_v29 }
 0x217   :  { %v800_v59 = vmul.f32 -1.442695, %v478_v50 }
 0x218   :  { %v801_v0 = vmul.f32 -1.442695, %v480_v33  ;;  %v483_v34 = vpop.f32.mrb[6].mxu1  ;;  %v223_v14 = vmul.f32 0.044715, %v1288_v32  ;;  %v225_v50 = vmul.f32 %v221_v52, %v1278_v29 }
 0x219   :  { %v485_v35 = vpop.f32.mrb[7].mxu1  ;;  %v484_v60 = vadd.f32 %v483_v34, %v394_v39 }
 0x21a   :  { %884 = vpow2.f32 %v801_v0  ;;  %v486_v36 = vadd.f32 %v485_v35, %v398_v11  ;;  %v1290_v0 = vpop.permute.xlu1 %79 }
 0x21b   :  { %v802_v63 = vmul.f32 -1.442695, %v484_v60  ;;  %vm86_vm14 = vcmp.eq.s32.totalorder %v1290_v0, 0 }
 0x21c   :  { %v881_v37 = vpop.eup %880  ;;  %v803_v38 = vmul.f32 -1.442695, %v486_v36  ;;  %vm610_vm15 = vmor %vm86_vm14, %vm606_vm13  ;;  %vm688_vm13 = vcmp.ge.s32.totalorder %v1182_v5, 4 }
 0x21d   :  { %v513_v40 = vadd.f32 1.0, %v881_v37  ;;  %v222_v37 = vmul.f32 0.044715, %v1283_v31 }
 0x21f   :  { %886 = vrcp.f32 %v513_v40  ;;  %v224_v40 = vmul.f32 0.044715, %v1293_v48 }
 0x220   :  { %v883_v41 = vpop.eup %882  ;;  %888 = vpow2.f32 %v803_v38 }
 0x221   :  { %v515_v47 = vadd.f32 1.0, %v883_v41 }
 0x223   :  { %890 = vrcp.f32 %v515_v47 }
 0x224   :  { %v885_v51 = vpop.eup %884 }
 0x225   :  { %v517_v57 = vadd.f32 1.0, %v885_v51 }
 0x227   :  { %892 = vrcp.f32 %v517_v57  ;;  %v227_v57 = vmul.f32 %v223_v14, %v1288_v32 }
 0x228   :  { %894 = vpow2.f32 %v796_v55  ;;  %v226_v55 = vmul.f32 %v222_v37, %v1283_v31 }
 0x229   :  { %v887_v2 = vpop.eup %886  ;;  %896 = vpow2.f32 %v798_v58 }
 0x22a   :  { %v889_v4 = vpop.eup %888  ;;  %v536_v62 = vmul.f32 -8.0, %v887_v2  ;;  %898 = vpow2.f32 %v800_v59  ;;  %v1325_v59 = vpop.permute.xlu1 %82 }
 0x22b   :  { %v519_v8 = vadd.f32 1.0, %v889_v4  ;;  %vm87_vm2 = vcmp.eq.s32.totalorder %v1325_v59, 0 }
 0x22c   :  { %v544_v9 = vmul.f32 %v543_v61, %v536_v62 }
 0x22d   :  { %v891_v10 = vpop.eup %890  ;;  %900 = vrcp.f32 %v519_v8 }
 0x22e   :  { %v548_v12 = vmul.f32 1.442695, %v544_v9  ;;  %v537_v13 = vmul.f32 -8.0, %v891_v10  ;;  %902 = vpow2.f32 %v802_v63 }
 0x230   :  { %904 = vpow2.f32 %v548_v12  ;;  %v545_v15 = vmul.f32 %v543_v61, %v537_v13  ;;  %v1340_v12 = vmul.f32 %v225_v50, %v1278_v29  ;;  %v1343_v13 = vmul.f32 %v226_v55, %v1283_v31 }
 0x231   :  { %v893_v56 = vpop.eup %892 }
 0x232   :  { %v550_v16 = vmul.f32 1.442695, %v545_v15  ;;  %v538_v17 = vmul.f32 -8.0, %v893_v56  ;;  %v895_v46 = vpop.eup %894  ;;  %v1346_v15 = vmul.f32 %v227_v57, %v1288_v32 }
 0x233   :  { %v897_v54 = vpop.eup %896  ;;  %v512_v11 = vadd.f32 1.0, %v895_v46 }
 0x234   :  { %906 = vpow2.f32 %v550_v16  ;;  %v546_v19 = vmul.f32 %v543_v61, %v538_v17  ;;  %v899_v21 = vpop.eup %898  ;;  %v514_v26 = vadd.f32 1.0, %v897_v54 }
 0x235   :  { %v516_v18 = vadd.f32 1.0, %v899_v21 }
 0x236   :  { %v552_v23 = vmul.f32 1.442695, %v546_v19 }
 0x237   :  { %v901_v25 = vpop.eup %900 }
 0x238   :  { %908 = vpow2.f32 %v552_v23  ;;  %v539_v27 = vmul.f32 -8.0, %v901_v25  ;;  %v903_v28 = vpop.eup %902 }
 0x239   :  { %910 = vrcp.f32 %v512_v11  ;;  %v518_v34 = vadd.f32 1.0, %v903_v28 }
 0x23a   :  { %v905_v30 = vpop.eup %904  ;;  %v547_v45 = vmul.f32 %v543_v61, %v539_v27  ;;  %912 = vrcp.f32 %v514_v26  ;;  %v228_v61 = vmul.f32 %v224_v40, %v1293_v48 }
 0x23b   :  { %v556_v33 = vmul.f32 %v905_v30, %v905_v30  ;;  %914 = vrcp.f32 %v516_v18  ;;  %v1308_v39 = vsel %vm608_vm11, 0.0, %v905_v30  ;;  %vm696_vm11 = vcmp.lt.s32.totalorder %v1135_v44, 4 }
 0x23c   :  { %v554_v35 = vmul.f32 1.442695, %v547_v45  ;;  %v616_v51 = vrot.slane %v1308_v39, 7  ;;  %v1350_v16 = vmul.f32 %v228_v61, %v1293_v48 }
 0x23d   :  { %v1300_v36 = vsub.f32 1.0, %v556_v33 }
 0x23e   :  { %v907_v1 = vpop.eup %906  ;;  %916 = vpow2.f32 %v554_v35  ;;  %v236_v59 = vadd.f32 %v1350_v16, %v1293_v48 }
 0x23f   :  { %v557_v38 = vmul.f32 %v907_v1, %v907_v1  ;;  %918 = vrsqrt.f32 %v1300_v36  ;;  %v1313_v41 = vsel %vm85_vm12, 0.0, %v907_v1  ;;  %vm566_vm5 = vcmp.eq.f32.partialorder %v1300_v36, inf }
 0x240   :  { %920 = vrcp.f32 %v518_v34  ;;  %v617_v47 = vrot.slane %v1313_v41, 7  ;;  %vm568_vm8 = vcmp.eq.f32.partialorder %v1300_v36, 0.0 }
 0x241   :  { %v1315_v43 = vsub.f32 1.0, %v557_v38 }
 0x242   :  { %v909_v49 = vpop.eup %908  ;;  %v622_v2 = vsel %vm276_vm0, %v616_v51, %v617_v47 }
 0x243   :  { %v558_v58 = vmul.f32 %v909_v49, %v909_v49  ;;  %922 = vrsqrt.f32 %v1315_v43  ;;  %v911_v60 = vpop.eup %910  ;;  %v1330_v4 = vsel %vm610_vm15, 0.0, %v909_v49  ;;  %v1335_v8 = vmul.f32 %v622_v2, %v1313_v41 }
 0x244   :  { %v913_v62 = vpop.eup %912  ;;  %v618_v9 = vrot.slane %v1330_v4, 7  ;;  %v596_v17 = vmul.f32 %v911_v60, %v1246_v6  ;;  %vm573_vm9 = vcmp.eq.f32.partialorder %v1315_v43, inf  ;;  %v576_v37 = vand.u32 2147483648, %v1315_v43 }
 0x245   :  { %v1332_v63 = vsub.f32 1.0, %v558_v58  ;;  %v915_v10 = vpop.eup %914  ;;  %v597_v46 = vmul.f32 %v913_v62, %v1226_v42  ;;  %v653_v18 = vrot.slane %v1335_v8, 6  ;;  %vm690_vm15 = vcmp.ge.s32.totalorder %v1207_v24, 4 }
 0x246   :  { %v621_v54 = vsel %vm276_vm0, %v617_v47, %v618_v9  ;;  %v1357_v22 = vmul.f32 %v915_v10, %v1257_v20  ;;  %v569_v20 = vand.u32 2147483648, %v1300_v36 }
 0x247   :  { %924 = vrsqrt.f32 %v1332_v63  ;;  %v626_v11 = vsel %vm283_vm6, %v621_v54, 1.0  ;;  %v583_v60 = vand.u32 2147483648, %v1332_v63 }
 0x248   :  { %v917_v56 = vpop.eup %916  ;;  %v1368_v42 = vmul.f32 %v626_v11, %v1330_v4 }
 0x249   :  { %v919_v19 = vpop.eup %918  ;;  %v559_v21 = vmul.f32 %v917_v56, %v917_v56  ;;  %v1363_v23 = vsel %vm87_vm2, 0.0, %v917_v56 }
 0x24a   :  { %v921_v25 = vpop.eup %920  ;;  %v565_v6 = vmul.f32 %v919_v19, %v1300_v36  ;;  %v619_v26 = vrot.slane %v1363_v23, 7  ;;  %v654_v30 = vrot.slane %v1368_v42, 6 }
 0x24b   :  { %v1374_v27 = vsub.f32 1.0, %v559_v21  ;;  %v1386_v52 = vmul.f32 %v921_v25, %v1261_v3 }
 0x24c   :  { %v567_v28 = vsel %vm566_vm5, %v1300_v36, %v565_v6  ;;  %v620_v45 = vsel %vm276_vm0, %v618_v9, %v619_v26  ;;  %v623_v33 = vsel %vm276_vm0, %v619_v26, %v616_v51  ;;  %v657_v14 = vsel %vm305_vm1, %v653_v18, %v654_v30 }
 0x24d   :  { %v923_v34 = vpop.eup %922  ;;  %v570_v35 = vsel %vm568_vm8, %v569_v20, %v567_v28  ;;  %926 = vrsqrt.f32 %v1374_v27  ;;  %v662_v40 = vsel %vm312_vm7, %v657_v14, 1.0  ;;  %v624_v47 = vsel %vm281_vm3, %v623_v33, 1.0 }
 0x24e   :  { %v592_v36 = vsel %vm84_vm10, 1.0, %v570_v35  ;;  %v572_v1 = vmul.f32 %v923_v34, %v1315_v43  ;;  %v1401_v3 = vmul.f32 %v620_v45, %v1363_v23  ;;  %vm575_vm10 = vcmp.eq.f32.partialorder %v1315_v43, 0.0 }
 0x24f   :  { %v1394_v38 = vmul.f32 %v596_v17, %v592_v36  ;;  %v1406_v49 = vmul.f32 %v662_v40, %v1368_v42  ;;  %v1411_v50 = vmul.f32 %v624_v47, %v1308_v39  ;;  %vm580_vm5 = vcmp.eq.f32.partialorder %v1332_v63, inf }
 0x250   :  { %v574_v7 = vsel %vm573_vm9, %v1315_v43, %v572_v1  ;;  %vm582_vm8 = vcmp.eq.f32.partialorder %v1332_v63, 0.0  ;;  %v655_v57 = vrot.slane %v1401_v3, 6  ;;  %vm587_vm9 = vcmp.eq.f32.partialorder %v1374_v27, inf }
 0x251   :  { %v925_v51 = vpop.eup %924  ;;  %v577_v55 = vsel %vm575_vm10, %v576_v37, %v574_v7  ;;  %v652_v61 = vrot.slane %v1411_v50, 6  ;;  %v628_v2 = vrot.slane %v1394_v38, 7  ;;  %v694_v11 = vrot.slane %v1406_v49, 4 }
 0x252   :  { %v593_v43 = vsel %vm85_vm12, 1.0, %v577_v55  ;;  %v579_v58 = vmul.f32 %v925_v51, %v1332_v63  ;;  %v656_v9 = vsel %vm305_vm1, %v654_v30, %v655_v57  ;;  %vm589_vm12 = vcmp.eq.f32.partialorder %v1374_v27, 0.0 }
 0x253   :  { %v601_v62 = vmul.f32 %v597_v46, %v593_v43  ;;  %v658_v53 = vsel %vm305_vm1, %v652_v61, %v653_v18  ;;  %v659_v56 = vsel %vm305_vm1, %v655_v57, %v652_v61  ;;  %v1431_v17 = vmul.f32 %v656_v9, %v1401_v3 }
 0x254   :  { %v581_v10 = vsel %vm580_vm5, %v1332_v63, %v579_v58  ;;  %v660_v46 = vsel %vm310_vm4, %v659_v56, 1.0  ;;  %v1436_v21 = vmul.f32 %v658_v53, %v1335_v8  ;;  %v590_v35 = vand.u32 2147483648, %v1374_v27 }
 0x255   :  { %v629_v54 = vrot.slane %v601_v62, 7  ;;  %v584_v19 = vsel %vm582_vm8, %v583_v60, %v581_v10  ;;  %v1442_v25 = vmul.f32 %v660_v46, %v1411_v50  ;;  %v695_v6 = vrot.slane %v1431_v17, 4 }
 0x256   :  { %v594_v63 = vsel %vm86_vm14, 1.0, %v584_v19  ;;  %v693_v28 = vrot.slane %v1436_v21, 4  ;;  %v235_v55 = vadd.f32 %v1346_v15, %v1288_v32  ;;  %v233_v15 = vadd.f32 %v1340_v12, %v1278_v29 }
 0x257   :  { %v927_v26 = vpop.eup %926  ;;  %v634_v20 = vsel %vm276_vm0, %v628_v2, %v629_v54  ;;  %v602_v18 = vmul.f32 %v1357_v22, %v594_v63  ;;  %v692_v45 = vrot.slane %v1442_v25, 4  ;;  %v697_v33 = vsel %vm696_vm11, %v694_v11, %v695_v6 }
 0x258   :  { %v641_v0 = vmul.f32 %v634_v20, %v1313_v41  ;;  %v586_v30 = vmul.f32 %v927_v26, %v1374_v27  ;;  %v698_v36 = vsel %vm696_vm11, %v693_v28, %v694_v11  ;;  %v1459_v22 = vmul.f32 %v697_v33, %v1431_v17 }
 0x259   :  { %v630_v34 = vrot.slane %v602_v18, 7  ;;  %v699_v37 = vsel %vm696_vm11, %v692_v45, %v693_v28  ;;  %v700_v14 = vsel %vm696_vm11, %v695_v6, %v692_v45  ;;  %v703_v51 = vsel %vm690_vm15, %v698_v36, 1.0 }
 0x25a   :  { %v645_v1 = vadd.f32 %v641_v0, %v601_v62  ;;  %v588_v41 = vsel %vm587_vm9, %v1374_v27, %v586_v30  ;;  %v701_v7 = vsel %vm688_vm13, %v700_v14, 1.0  ;;  %v1486_v61 = vmul.f32 %v699_v37, %v1436_v21 }
 0x25b   :  { %v633_v40 = vsel %vm276_vm0, %v629_v54, %v630_v34  ;;  %v591_v47 = vsel %vm589_vm12, %v590_v35, %v588_v41  ;;  %v1481_v43 = vmul.f32 %v701_v7, %v1442_v25  ;;  %v1489_v62 = vmul.f32 %v703_v51, %v1406_v49 }
 0x25c   :  { %v638_v27 = vsel %vm283_vm6, %v633_v40, 0.0  ;;  %v595_v57 = vsel %vm87_vm2, 1.0, %v591_v47  ;;  %v234_v53 = vadd.f32 %v1343_v13, %v1283_v31  ;;  %v665_v56 = vrot.slane %v645_v1, 6 }
 0x25d   :  { %v642_v58 = vmul.f32 %v638_v27, %v1330_v4  ;;  %v603_v60 = vmul.f32 %v1386_v52, %v595_v57  ;;  %v239_v4 = vmul.f32 0.7978846, %v235_v55  ;;  %v237_v46 = vmul.f32 0.7978846, %v233_v15 }
 0x25e   :  { %v240_v63 = vmul.f32 0.7978846, %v236_v59  ;;  %v238_v6 = vmul.f32 0.7978846, %v234_v53  ;;  %v219_v53 = vmul.f32 0.5, %v1288_v32 }
 0x25f   :  { %v646_v9 = vadd.f32 %v642_v58, %v602_v18  ;;  %v631_v10 = vrot.slane %v603_v60, 7  ;;  %928 = vtanh.f32 %v239_v4 }
 0x260   :  { %930 = vtanh.f32 %v237_v46  ;;  %v737_v46 = vmul.f32 0.0, %v1481_v43 }
 0x261   :  { %v666_v52 = vrot.slane %v646_v9, 6  ;;  %v632_v54 = vsel %vm276_vm0, %v630_v34, %v631_v10  ;;  %v635_v19 = vsel %vm276_vm0, %v631_v10, %v628_v2  ;;  %932 = vtanh.f32 %v240_v63 }
 0x262   :  { %v636_v12 = vsel %vm281_vm3, %v635_v19, 0.0  ;;  %v643_v16 = vmul.f32 %v632_v54, %v1363_v23  ;;  %934 = vtanh.f32 %v238_v6  ;;  %v217_v54 = vmul.f32 0.5, %v1278_v29 }
 0x263   :  { %v669_v11 = vsel %vm305_vm1, %v665_v56, %v666_v52  ;;  %v640_v13 = vmul.f32 %v636_v12, %v1308_v39 }
 0x264   :  { %v674_v26 = vsel %vm312_vm7, %v669_v11, 0.0  ;;  %v647_v20 = vadd.f32 %v643_v16, %v603_v60 }
 0x265   :  { %v678_v2 = vmul.f32 %v674_v26, %v1368_v42  ;;  %v644_v18 = vadd.f32 %v640_v13, %v1394_v38 }
 0x266   :  { %v667_v28 = vrot.slane %v647_v20, 6 }
 0x267   :  { %v682_v23 = vadd.f32 %v678_v2, %v646_v9  ;;  %v664_v0 = vrot.slane %v644_v18, 6 }
 0x268   :  { %v668_v30 = vsel %vm305_vm1, %v666_v52, %v667_v28  ;;  %v739_v52 = vmul.f32 0.0, %v1489_v62 }
 0x269   :  { %v670_v39 = vsel %vm305_vm1, %v664_v0, %v665_v56  ;;  %v671_v45 = vsel %vm305_vm1, %v667_v28, %v664_v0  ;;  %v679_v33 = vmul.f32 %v668_v30, %v1401_v3  ;;  %v707_v41 = vrot.slane %v682_v23, 4  ;;  %v929_v40 = vpop.eup %928 }
 0x26a   :  { %v672_v42 = vsel %vm310_vm4, %v671_v45, 0.0  ;;  %v677_v38 = vmul.f32 %v670_v39, %v1335_v8  ;;  %v931_v55 = vpop.eup %930  ;;  %v247_v57 = vadd.f32 1.0, %v929_v40 }
 0x26b   :  { %v676_v34 = vmul.f32 %v672_v42, %v1411_v50  ;;  %v683_v35 = vadd.f32 %v679_v33, %v647_v20  ;;  %v933_v8 = vpop.eup %932  ;;  %v245_v10 = vadd.f32 1.0, %v931_v55 }
 0x26c   :  { %v681_v36 = vadd.f32 %v677_v38, %v645_v1  ;;  %v935_v60 = vpop.eup %934  ;;  %v248_v56 = vadd.f32 1.0, %v933_v8 }
 0x26d   :  { %v680_v37 = vadd.f32 %v676_v34, %v644_v18  ;;  %v708_v14 = vrot.slane %v683_v35, 4  ;;  %v246_v19 = vadd.f32 1.0, %v935_v60  ;;  %v249_v32 = vmul.f32 %v245_v10, %v217_v54 }
 0x26e   :  { %v706_v47 = vrot.slane %v681_v36, 4 }
 0x26f   :  { %v705_v7 = vrot.slane %v680_v37, 4  ;;  %v709_v51 = vsel %vm696_vm11, %v707_v41, %v708_v14 }
 0x270   :  { %v710_v3 = vsel %vm696_vm11, %v706_v47, %v707_v41  ;;  %v720_v27 = vmul.f32 %v709_v51, %v1431_v17 }
 0x271   :  { %v711_v50 = vsel %vm696_vm11, %v705_v7, %v706_v47  ;;  %v712_v1 = vsel %vm696_vm11, %v708_v14, %v705_v7  ;;  %v715_v58 = vsel %vm690_vm15, %v710_v3, 0.0 }
 0x272   :  { %v713_v15 = vsel %vm688_vm13, %v712_v1, 0.0  ;;  %v718_v59 = vmul.f32 %v711_v50, %v1436_v21  ;;  %v719_v9 = vmul.f32 %v715_v58, %v1406_v49  ;;  %v724_v17 = vadd.f32 %v720_v27, %v683_v35 }
 0x273   :  { %v717_v4 = vmul.f32 %v713_v15, %v1442_v25  ;;  %v251_v21 = vmul.f32 %v247_v57, %v219_v53  ;;  %v220_v49 = vmul.f32 0.5, %v1293_v48  ;;  %v218_v25 = vmul.f32 0.5, %v1283_v31 }
 0x274   :  { %v723_v44 = vadd.f32 %v719_v9, %v682_v23  ;;  %v722_v24 = vadd.f32 %v718_v59, %v681_v36 }
 0x275   :  { %v721_v5 = vadd.f32 %v717_v4, %v680_v37  ;;  %v252_v11 = vmul.f32 %v248_v56, %v220_v49  ;;  %v250_v43 = vmul.f32 %v246_v19, %v218_v25 }
 0x276   :  { %v740_v12 = vmul.f32 %v1459_v22, %v723_v44  ;;  %v743_v16 = vadd.f32 %v739_v52, %v723_v44 }
 0x277   :  { %v738_v62 = vmul.f32 %v1486_v61, %v721_v5  ;;  %v741_v63 = vadd.f32 %v737_v46, %v721_v5 }
 0x278   :  { %v744_v29 = vadd.f32 %v740_v12, %v724_v17  ;;  %747 = vst [vmem:[#allocation8 + $0x10] sm:$0xff] %v743_v16  ;;  %v751_v13 = vmul.f32 %v743_v16, %v251_v21 }
 0x279   :  { %745 = vst [vmem:[#allocation8] sm:$0xff] %v741_v63  ;;  %v742_v48 = vadd.f32 %v738_v62, %v722_v24  ;;  %v749_v6 = vmul.f32 %v741_v63, %v249_v32 }
 0x27a   :  { %748 = vst [vmem:[#allocation8 + $0x18] sm:$0xff] %v744_v29  ;;  %v752_v22 = vmul.f32 %v744_v29, %v252_v11  ;;  %755 = vst [vmem:[#allocation7 + $0x10] sm:$0xff] %v751_v13 }
 0x27b   :  { %v750_v26 = vmul.f32 %v742_v48, %v250_v43  ;;  %753 = vst [vmem:[#allocation7] sm:$0xff] %v749_v6  ;;  %746 = vst [vmem:[#allocation8 + $0x8] sm:$0xff] %v742_v48 }
 0x27c   :  { %756 = vst [vmem:[#allocation7 + $0x18] sm:$0xff] %v752_v22 }
 0x27d   :  { %991 = shalt.err (!%p988_p6)
}
 0x27e   :  { %s992_s27 = scalar_lea.hbm %s1583_s6, 512 }
 0x27f   :  { %p993_p7 = scmp.ne.s32.totalorder %s1583_s6, %s992_s27  ;;  %p996_p8 = scmp.lt.u32.totalorder %s992_s27, %s1583_s6 }
 0x281   :  { %p998_p9 = pnand %p996_p8, %p993_p7 }
 0x283   :  { %1001 = shalt.err (!%p998_p9)
}
 0x284   :  { %s1040_s9 = smov 128   ;;  %s1041_s0 = smov 8   ;;  %754 = vst [vmem:[#allocation7 + $0x8] sm:$0xff] %v750_v26 }
 0x285   :  { %780 = dma.vmem_to_hbm [thread:$0]  %s775_s23, 512, %s1583_s6, [#allocation9], %s1040_s9, %s1040_s9, %s1041_s0  }
 0x286   :  { %s1002_s12 = scalar_lea.vmem %s1546_s2, 512  ;;  %p1007_p11 = scmp.lt.s32.totalorder %s1546_s2, %s1546_s2 }
 0x287   :  { %p1003_p10 = scmp.ne.s32.totalorder %s1546_s2, %s1002_s12  ;;  %p1008_p12 = scmp.lt.s32.totalorder %s1002_s12, %s1002_s12 }
 0x289   :  { %p1009_p13 = por %p1008_p12, %p1007_p11 }
 0x28b   :  { %p1010_p0 = pnand %p1009_p13, %p1003_p10 }
 0x28d   :  { %1013 = shalt.err (!%p1010_p0)
}
 0x28e   :  { %s1014_s15 = scalar_lea.hbm %s1582_s5, 512 }
 0x28f   :  { %p1015_p1 = scmp.ne.s32.totalorder %s1582_s5, %s1014_s15  ;;  %p1018_p2 = scmp.lt.u32.totalorder %s1014_s15, %s1582_s5 }
 0x291   :  { %p1020_p3 = pnand %p1018_p2, %p1015_p1 }
 0x293   :  { %1023 = shalt.err (!%p1020_p3)
}
 0x294   :  { %768 = dma.vmem_to_hbm [thread:$0]  %s1546_s2, 512, %s1582_s5, [#allocation4], %s1040_s9, %s1040_s9, %s1041_s0  }
 0x295   :  { %1028 = dma.done.wait [#allocation4], 512  }
 0x296   :  { %1029 = vsyncadd [#allocation4], 4294966784 }
 0x297   :  { %1030 = dma.done.wait [#allocation9], 512  }
 0x298   :  { %1031 = vsyncadd [#allocation9], 4294966784 }
 0x299   :  { %791 = vsyncpa [#allocation3], 1 }
 0x29a   :  { %792 = vsyncpa [#allocation6], 1 }
 0x29b   :  { %793 = vsyncpa [#allocation4], 1 }
 0x29c   :  { %794 = vsyncpa [#allocation9], 1 }

</bundles_post_ra>
